<compile_context>
chip_gen: v7x
topology: tpu7x:2x2x1
jax: 0.10.0
libtpu: 0.0.40
codegen_flags: <defaults>
</compile_context>

<pallas_src>
import functools

import jax
import jax.numpy as jnp
from jax import lax
from jax.experimental import pallas as pl
from jax.experimental.pallas import tpu as pltpu


_LEAKY_SLOPE = 0.01   # F.leaky_relu default negative slope
_LN_EPS = 1e-5        # nn.LayerNorm default eps


def _leaky_relu(y):
    return jnp.where(y >= 0.0, y, _LEAKY_SLOPE * y)


def _mlp_kernel(x_ref, lng_ref, lnb_ref,
                w1_ref, b1_ref, w2_ref, b2_ref, w3_ref, b3_ref,
                w4_ref, b4_ref, w5_ref, b5_ref, o_ref):
    """Fused LayerNorm + fc1..fc5 (+ leaky_relu) for one (tm, K) row tile.

    All intermediates stay in VMEM / vregs (no HBM round trips).  LayerNorm
    and activations are computed in f32; matmul operands are bf16 (native MXU
    path) with f32 accumulation.
    """
    x = x_ref[...]                                          # (tm, K) f32

    # LayerNorm over the feature dim.
    mu = jnp.mean(x, axis=-1, keepdims=True)
    d = x - mu
    var = jnp.mean(d * d, axis=-1, keepdims=True)
    h = d * lax.rsqrt(var + _LN_EPS) * lng_ref[...] + lnb_ref[...]

    def dense(a, w_ref, b_ref, act):
        y = jnp.dot(a.astype(jnp.bfloat16), w_ref[...],
                    preferred_element_type=jnp.float32) + b_ref[...]
        return _leaky_relu(y) if act else y

    h = dense(h, w1_ref, b1_ref, True)          # (tm, H)
    h = dense(h, w2_ref, b2_ref, True)          # (tm, 4H)  widest intermediate
    h = dense(h, w3_ref, b3_ref, True)          # (tm, H)
    h = dense(h, w4_ref, b4_ref, True)          # (tm, 32)
    o_ref[...] = dense(h, w5_ref, b5_ref, False)            # (tm, out)


def _round_up(a, b):
    return ((a + b - 1) // b) * b


def _choose_tile(mp, row_tile):
    """Largest multiple-of-8 divisor of mp that is <= row_tile, preferring a
    tile that leaves >= 2 grid steps (so v7x's 2 TensorCores both get work)."""
    cap = min(mp, max(8, _round_up(row_tile, 8)))
    best_any, best_multi = 8, None
    t = 8
    while t <= cap:
        if mp % t == 0:
            best_any = t
            if mp // t >= 2:
                best_multi = t
        t += 8
    return best_multi if best_multi is not None else best_any


def _vmem_limit_bytes(tm, input_size, hidden, output_size):
    """Explicit VMEM budget: resident bf16 weights (single-buffered) + f32
    biases/LN + double-buffered I/O tiles + largest intermediates, with 2x
    headroom; floored at 32 MiB and capped below v7x's 64 MiB physical."""
    bf, f4 = 2, 4
    h4 = 4 * hidden
    w = (input_size * hidden + hidden * h4 + h4 * hidden
         + hidden * 32 + 32 * output_size) * bf
    small = (2 * input_size + hidden + h4 + hidden + 32 + output_size) * f4
    io = 2 * tm * input_size * f4 + 2 * tm * output_size * f4
    act = tm * (input_size + hidden + h4 + 32) * f4 \
        + tm * max(input_size, h4) * bf
    need = w + small + io + act
    return int(min(max(2 * need, 32 << 20), 56 << 20))


def prepare_params(params):
    """One-time host-side prep (run OUTSIDE the jitted forward): transpose the
    torch-layout (out, in) weights to (in, out) and cast matmul operands to
    bf16; LayerNorm params and biases stay f32."""
    f32, bf16 = jnp.float32, jnp.bfloat16
    out = {
        "ln_g": jnp.asarray(params["ln_g"]).reshape(1, -1).astype(f32),
        "ln_b": jnp.asarray(params["ln_b"]).reshape(1, -1).astype(f32),
    }
    for i in range(1, 6):
        out[f"w{i}"] = jnp.asarray(params[f"w{i}"]).T.astype(bf16)
        out[f"b{i}"] = jnp.asarray(params[f"b{i}"]).reshape(1, -1).astype(f32)
    return out


def mlp_forward(x, p, *, input_size, output_size, row_tile=512):
    """Eval-mode forward of the PyTorch MLP (dropout == identity).

    `p` must come from prepare_params() (weights already (in, out) bf16).
    """
    x2 = x.reshape(-1, input_size).astype(jnp.float32)
    M = x2.shape[0]
    hidden = p["w1"].shape[1]

    # Sublane-align the row count (pads <= 7 rows; negligible copy).
    Mp = _round_up(M, 8)
    if Mp != M:
        x2 = jnp.pad(x2, ((0, Mp - M), (0, 0)))

    tm = _choose_tile(Mp, row_tile)
    if tm * 16 < min(Mp, row_tile):
        # Pathological row counts only (e.g. 8 * large prime): pay one padding
        # copy so per-grid-step overhead stays amortized with a big tile.
        tm = min(_round_up(row_tile, 8), Mp)
        new_mp = _round_up(Mp, tm)
        x2 = jnp.pad(x2, ((0, new_mp - Mp), (0, 0)))
        Mp = new_mp

    def full(a):
        # Constant-index resident block: fetched once.  Buffered(1) avoids the
        # default double-buffer so resident weights are not duplicated in VMEM
        # (matters on v7x's 64 MiB VMEM).
        return pl.BlockSpec(a.shape, lambda i: (0, 0),
                            pipeline_mode=pl.Buffered(1))

    operands = (x2, p["ln_g"], p["ln_b"],
                p["w1"], p["b1"], p["w2"], p["b2"], p["w3"], p["b3"],
                p["w4"], p["b4"], p["w5"], p["b5"])

    out = pl.pallas_call(
        _mlp_kernel,
        out_shape=jax.ShapeDtypeStruct((Mp, output_size), jnp.float32),
        grid=(Mp // tm,),
        in_specs=[pl.BlockSpec((tm, input_size), lambda i: (i, 0))]
                 + [full(a) for a in operands[1:]],
        out_specs=pl.BlockSpec((tm, output_size), lambda i: (i, 0)),
        compiler_params=pltpu.CompilerParams(
            dimension_semantics=("parallel",),
            vmem_limit_bytes=_vmem_limit_bytes(tm, input_size, hidden,
                                               output_size)),
    )(*operands)

    # TODO(synk): at production sizes (hidden=1024) the bf16 fc2/fc3 weights
    # are ~8 MiB each and still fit fully resident (bf16 + Buffered(1)) on all
    # generations; switch to a K-tiled streaming reduction for fc2/fc3 only if
    # larger row tiles are needed within v7x's 64 MiB VMEM.
    # NOTE: output_size < 128 lanes -> masked output stores; relayout to a
    # lane-dense slab only if profiling shows the store slot saturating.
    return out[:M].reshape(-1, output_size)


# ------------------------------- reference ---------------------------------

def mlp_reference(x, params, *, input_size, output_size):
    x2 = x.reshape(-1, input_size).astype(jnp.float32)
    mu = x2.mean(-1, keepdims=True)
    var = ((x2 - mu) ** 2).mean(-1, keepdims=True)
    h = (x2 - mu) / jnp.sqrt(var + _LN_EPS) * params["ln_g"] + params["ln_b"]
    h = _leaky_relu(h @ params["w1"].T + params["b1"])
    h = _leaky_relu(h @ params["w2"].T + params["b2"])
    h = _leaky_relu(h @ params["w3"].T + params["b3"])
    h = _leaky_relu(h @ params["w4"].T + params["b4"])
    h = h @ params["w5"].T + params["b5"]
    return h.reshape(-1, output_size)


def init_params(key, *, input_size, output_size, hidden_size):
    ks = iter(jax.random.split(key, 12))

    def w(shape, scale=0.05):
        return (scale * jax.random.normal(next(ks), shape)).astype(jnp.float32)

    return {
        "ln_g": jnp.ones((input_size,), jnp.float32),
        "ln_b": jnp.zeros((input_size,), jnp.float32),
        "w1": w((hidden_size, input_size)),       "b1": w((hidden_size,), 0.01),
        "w2": w((4 * hidden_size, hidden_size)),  "b2": w((4 * hidden_size,), 0.01),
        "w3": w((hidden_size, 4 * hidden_size)),  "b3": w((hidden_size,), 0.01),
        "w4": w((32, hidden_size)),               "b4": w((32,), 0.01),
        "w5": w((output_size, 32)),               "b5": w((output_size,), 0.01),
    }


if __name__ == "__main__":
    # Small shapes consistent with the module: x.view(-1, input_size).
    batch, channels, H, W = 2, 4, 16, 16          # x: (2, 4, 16, 16)
    input_size = H * W                            # 256 -> M = batch*channels = 8
    hidden_size = 32                              # 4*hidden = 128 (lane-dense)
    output_size = 16

    key = jax.random.PRNGKey(0)
    kx, kp = jax.random.split(key)
    x = jax.random.normal(kx, (batch, channels, H, W), jnp.float32)
    params = init_params(kp, input_size=input_size, output_size=output_size,
                         hidden_size=hidden_size)

    prepped = prepare_params(params)   # one-time transpose/cast, outside jit
    fwd = jax.jit(functools.partial(mlp_forward, input_size=input_size,
                                    output_size=output_size))
    out = fwd(x, prepped)
    jax.block_until_ready(out)

    ref = mlp_reference(x, params, input_size=input_size,
                        output_size=output_size)
    assert out.shape == (batch * channels, output_size), out.shape
    assert bool(jnp.all(jnp.isfinite(out)))
    # bf16 matmul operands (f32 accumulation) -> loosened tolerance vs the
    # pure-f32 reference.
    max_err = float(jnp.max(jnp.abs(out - ref)))
    assert bool(jnp.allclose(out, ref, rtol=2e-2, atol=2e-2)), max_err
    print("KERNEL_OK")
</pallas_src>

<mosaic_0001>
module attributes {stable_mosaic.version = 11 : i64} {
  func.func @_mlp_kernel(%arg0: i32, %arg1: memref<8x256xf32, #tpu.memory_space<vmem>>, %arg2: memref<1x256xf32, #tpu.memory_space<vmem>>, %arg3: memref<1x256xf32, #tpu.memory_space<vmem>>, %arg4: memref<256x32xbf16, #tpu.memory_space<vmem>>, %arg5: memref<1x32xf32, #tpu.memory_space<vmem>>, %arg6: memref<32x128xbf16, #tpu.memory_space<vmem>>, %arg7: memref<1x128xf32, #tpu.memory_space<vmem>>, %arg8: memref<128x32xbf16, #tpu.memory_space<vmem>>, %arg9: memref<1x32xf32, #tpu.memory_space<vmem>>, %arg10: memref<32x32xbf16, #tpu.memory_space<vmem>>, %arg11: memref<1x32xf32, #tpu.memory_space<vmem>>, %arg12: memref<32x16xbf16, #tpu.memory_space<vmem>>, %arg13: memref<1x16xf32, #tpu.memory_space<vmem>>, %arg14: memref<8x16xf32, #tpu.memory_space<vmem>>) attributes {dimension_semantics = [#tpu.dimension_semantics<parallel>], iteration_bounds = array<i64: 1>, scalar_prefetch = 0 : i64, scratch_operands = 0 : i64, tpu.core_type = #tpu.core_type<tc>, window_params = [{transform_indices = @transform_0, window_bounds = array<i64: 8, 256>}, {pipeline_mode = #tpu.pipeline_mode<synchronous>, transform_indices = @transform_1, window_bounds = array<i64: 1, 256>}, {pipeline_mode = #tpu.pipeline_mode<synchronous>, transform_indices = @transform_2, window_bounds = array<i64: 1, 256>}, {pipeline_mode = #tpu.pipeline_mode<synchronous>, transform_indices = @transform_3, window_bounds = array<i64: 256, 32>}, {pipeline_mode = #tpu.pipeline_mode<synchronous>, transform_indices = @transform_4, window_bounds = array<i64: 1, 32>}, {pipeline_mode = #tpu.pipeline_mode<synchronous>, transform_indices = @transform_5, window_bounds = array<i64: 32, 128>}, {pipeline_mode = #tpu.pipeline_mode<synchronous>, transform_indices = @transform_6, window_bounds = array<i64: 1, 128>}, {pipeline_mode = #tpu.pipeline_mode<synchronous>, transform_indices = @transform_7, window_bounds = array<i64: 128, 32>}, {pipeline_mode = #tpu.pipeline_mode<synchronous>, transform_indices = @transform_8, window_bounds = array<i64: 1, 32>}, {pipeline_mode = #tpu.pipeline_mode<synchronous>, transform_indices = @transform_9, window_bounds = array<i64: 32, 32>}, {pipeline_mode = #tpu.pipeline_mode<synchronous>, transform_indices = @transform_10, window_bounds = array<i64: 1, 32>}, {pipeline_mode = #tpu.pipeline_mode<synchronous>, transform_indices = @transform_11, window_bounds = array<i64: 32, 16>}, {pipeline_mode = #tpu.pipeline_mode<synchronous>, transform_indices = @transform_12, window_bounds = array<i64: 1, 16>}, {transform_indices = @transform_13, window_bounds = array<i64: 8, 16>}]} {
    %c0 = arith.constant 0 : index
    %c0_0 = arith.constant 0 : index
    %0 = vector.load %arg1[%c0, %c0_0] : memref<8x256xf32, #tpu.memory_space<vmem>>, vector<8x256xf32>
    %cst = arith.constant dense<0.000000e+00> : vector<8xf32>
    %1 = vector.multi_reduction <add>, %0, %cst [1] : vector<8x256xf32> to vector<8xf32>
    %2 = vector.shape_cast %1 : vector<8xf32> to vector<8x1xf32>
    %cst_1 = arith.constant 2.560000e+02 : f32
    %3 = vector.broadcast %cst_1 : f32 to vector<8x1xf32>
    %4 = arith.divf %2, %3 : vector<8x1xf32>
    %5 = vector.broadcast %4 : vector<8x1xf32> to vector<8x256xf32>
    %6 = arith.subf %0, %5 : vector<8x256xf32>
    %7 = arith.mulf %6, %6 : vector<8x256xf32>
    %cst_2 = arith.constant dense<0.000000e+00> : vector<8xf32>
    %8 = vector.multi_reduction <add>, %7, %cst_2 [1] : vector<8x256xf32> to vector<8xf32>
    %9 = vector.shape_cast %8 : vector<8xf32> to vector<8x1xf32>
    %cst_3 = arith.constant 2.560000e+02 : f32
    %10 = vector.broadcast %cst_3 : f32 to vector<8x1xf32>
    %11 = arith.divf %9, %10 : vector<8x1xf32>
    %cst_4 = arith.constant 9.99999974E-6 : f32
    %12 = vector.broadcast %cst_4 : f32 to vector<8x1xf32>
    %13 = arith.addf %11, %12 : vector<8x1xf32>
    %14 = math.rsqrt %13 : vector<8x1xf32>
    %15 = vector.broadcast %14 : vector<8x1xf32> to vector<8x256xf32>
    %16 = arith.mulf %6, %15 : vector<8x256xf32>
    %c0_5 = arith.constant 0 : index
    %c0_6 = arith.constant 0 : index
    %17 = vector.load %arg2[%c0_5, %c0_6] : memref<1x256xf32, #tpu.memory_space<vmem>>, vector<1x256xf32>
    %18 = vector.broadcast %17 : vector<1x256xf32> to vector<8x256xf32>
    %19 = arith.mulf %16, %18 : vector<8x256xf32>
    %c0_7 = arith.constant 0 : index
    %c0_8 = arith.constant 0 : index
    %20 = vector.load %arg3[%c0_7, %c0_8] : memref<1x256xf32, #tpu.memory_space<vmem>>, vector<1x256xf32>
    %21 = vector.broadcast %20 : vector<1x256xf32> to vector<8x256xf32>
    %22 = arith.addf %19, %21 : vector<8x256xf32>
    %23 = arith.truncf %22 : vector<8x256xf32> to vector<8x256xbf16>
    %c0_9 = arith.constant 0 : index
    %c0_10 = arith.constant 0 : index
    %24 = vector.load %arg4[%c0_9, %c0_10] : memref<256x32xbf16, #tpu.memory_space<vmem>>, vector<256x32xbf16>
    %cst_11 = arith.constant dense<0.000000e+00> : vector<8x32xf32>
    %25 = tpu.matmul %23, %24, %cst_11 {dimension_numbers = #tpu.dot_dimension_numbers<[1], [0], [0], [1], [0, 0, 1, 1], [], []>} : vector<8x256xbf16>, vector<256x32xbf16>, vector<8x32xf32> -> vector<8x32xf32>
    %c0_12 = arith.constant 0 : index
    %c0_13 = arith.constant 0 : index
    %26 = vector.load %arg5[%c0_12, %c0_13] : memref<1x32xf32, #tpu.memory_space<vmem>>, vector<1x32xf32>
    %27 = vector.broadcast %26 : vector<1x32xf32> to vector<8x32xf32>
    %28 = arith.addf %25, %27 : vector<8x32xf32>
    %cst_14 = arith.constant 0.000000e+00 : f32
    %29 = vector.broadcast %cst_14 : f32 to vector<8x32xf32>
    %30 = arith.cmpf oge, %28, %29 : vector<8x32xf32>
    %cst_15 = arith.constant 0.00999999977 : f32
    %31 = vector.broadcast %cst_15 : f32 to vector<8x32xf32>
    %32 = arith.mulf %31, %28 : vector<8x32xf32>
    %33 = arith.select %30, %28, %32 : vector<8x32xi1>, vector<8x32xf32>
    %34 = arith.truncf %33 : vector<8x32xf32> to vector<8x32xbf16>
    %c0_16 = arith.constant 0 : index
    %c0_17 = arith.constant 0 : index
    %35 = vector.load %arg6[%c0_16, %c0_17] : memref<32x128xbf16, #tpu.memory_space<vmem>>, vector<32x128xbf16>
    %cst_18 = arith.constant dense<0.000000e+00> : vector<8x128xf32>
    %36 = tpu.matmul %34, %35, %cst_18 {dimension_numbers = #tpu.dot_dimension_numbers<[1], [0], [0], [1], [0, 0, 1, 1], [], []>} : vector<8x32xbf16>, vector<32x128xbf16>, vector<8x128xf32> -> vector<8x128xf32>
    %c0_19 = arith.constant 0 : index
    %c0_20 = arith.constant 0 : index
    %37 = vector.load %arg7[%c0_19, %c0_20] : memref<1x128xf32, #tpu.memory_space<vmem>>, vector<1x128xf32>
    %38 = vector.broadcast %37 : vector<1x128xf32> to vector<8x128xf32>
    %39 = arith.addf %36, %38 : vector<8x128xf32>
    %cst_21 = arith.constant 0.000000e+00 : f32
    %40 = vector.broadcast %cst_21 : f32 to vector<8x128xf32>
    %41 = arith.cmpf oge, %39, %40 : vector<8x128xf32>
    %cst_22 = arith.constant 0.00999999977 : f32
    %42 = vector.broadcast %cst_22 : f32 to vector<8x128xf32>
    %43 = arith.mulf %42, %39 : vector<8x128xf32>
    %44 = arith.select %41, %39, %43 : vector<8x128xi1>, vector<8x128xf32>
    %45 = arith.truncf %44 : vector<8x128xf32> to vector<8x128xbf16>
    %c0_23 = arith.constant 0 : index
    %c0_24 = arith.constant 0 : index
    %46 = vector.load %arg8[%c0_23, %c0_24] : memref<128x32xbf16, #tpu.memory_space<vmem>>, vector<128x32xbf16>
    %cst_25 = arith.constant dense<0.000000e+00> : vector<8x32xf32>
    %47 = tpu.matmul %45, %46, %cst_25 {dimension_numbers = #tpu.dot_dimension_numbers<[1], [0], [0], [1], [0, 0, 1, 1], [], []>} : vector<8x128xbf16>, vector<128x32xbf16>, vector<8x32xf32> -> vector<8x32xf32>
    %c0_26 = arith.constant 0 : index
    %c0_27 = arith.constant 0 : index
    %48 = vector.load %arg9[%c0_26, %c0_27] : memref<1x32xf32, #tpu.memory_space<vmem>>, vector<1x32xf32>
    %49 = vector.broadcast %48 : vector<1x32xf32> to vector<8x32xf32>
    %50 = arith.addf %47, %49 : vector<8x32xf32>
    %cst_28 = arith.constant 0.000000e+00 : f32
    %51 = vector.broadcast %cst_28 : f32 to vector<8x32xf32>
    %52 = arith.cmpf oge, %50, %51 : vector<8x32xf32>
    %cst_29 = arith.constant 0.00999999977 : f32
    %53 = vector.broadcast %cst_29 : f32 to vector<8x32xf32>
    %54 = arith.mulf %53, %50 : vector<8x32xf32>
    %55 = arith.select %52, %50, %54 : vector<8x32xi1>, vector<8x32xf32>
    %56 = arith.truncf %55 : vector<8x32xf32> to vector<8x32xbf16>
    %c0_30 = arith.constant 0 : index
    %c0_31 = arith.constant 0 : index
    %57 = vector.load %arg10[%c0_30, %c0_31] : memref<32x32xbf16, #tpu.memory_space<vmem>>, vector<32x32xbf16>
    %cst_32 = arith.constant dense<0.000000e+00> : vector<8x32xf32>
    %58 = tpu.matmul %56, %57, %cst_32 {dimension_numbers = #tpu.dot_dimension_numbers<[1], [0], [0], [1], [0, 0, 1, 1], [], []>} : vector<8x32xbf16>, vector<32x32xbf16>, vector<8x32xf32> -> vector<8x32xf32>
    %c0_33 = arith.constant 0 : index
    %c0_34 = arith.constant 0 : index
    %59 = vector.load %arg11[%c0_33, %c0_34] : memref<1x32xf32, #tpu.memory_space<vmem>>, vector<1x32xf32>
    %60 = vector.broadcast %59 : vector<1x32xf32> to vector<8x32xf32>
    %61 = arith.addf %58, %60 : vector<8x32xf32>
    %cst_35 = arith.constant 0.000000e+00 : f32
    %62 = vector.broadcast %cst_35 : f32 to vector<8x32xf32>
    %63 = arith.cmpf oge, %61, %62 : vector<8x32xf32>
    %cst_36 = arith.constant 0.00999999977 : f32
    %64 = vector.broadcast %cst_36 : f32 to vector<8x32xf32>
    %65 = arith.mulf %64, %61 : vector<8x32xf32>
    %66 = arith.select %63, %61, %65 : vector<8x32xi1>, vector<8x32xf32>
    %67 = arith.truncf %66 : vector<8x32xf32> to vector<8x32xbf16>
    %c0_37 = arith.constant 0 : index
    %c0_38 = arith.constant 0 : index
    %68 = vector.load %arg12[%c0_37, %c0_38] : memref<32x16xbf16, #tpu.memory_space<vmem>>, vector<32x16xbf16>
    %cst_39 = arith.constant dense<0.000000e+00> : vector<8x16xf32>
    %69 = tpu.matmul %67, %68, %cst_39 {dimension_numbers = #tpu.dot_dimension_numbers<[1], [0], [0], [1], [0, 0, 1, 1], [], []>} : vector<8x32xbf16>, vector<32x16xbf16>, vector<8x16xf32> -> vector<8x16xf32>
    %c0_40 = arith.constant 0 : index
    %c0_41 = arith.constant 0 : index
    %70 = vector.load %arg13[%c0_40, %c0_41] : memref<1x16xf32, #tpu.memory_space<vmem>>, vector<1x16xf32>
    %71 = vector.broadcast %70 : vector<1x16xf32> to vector<8x16xf32>
    %72 = arith.addf %69, %71 : vector<8x16xf32>
    %c0_42 = arith.constant 0 : index
    %c0_43 = arith.constant 0 : index
    %73 = vector.load %arg14[%c0_42, %c0_43] : memref<8x16xf32, #tpu.memory_space<vmem>>, vector<8x16xf32>
    tpu.vector_store %arg14[%c0_42, %c0_43], %72 {strides = array<i32>} : memref<8x16xf32, #tpu.memory_space<vmem>>, vector<8x16xf32>,
    return
  }
  func.func @transform_0(%arg0: i32) -> (i32, i32) {
    %c0_i32 = arith.constant 0 : i32
    %c0_i32_0 = arith.constant 0 : i32
    return %arg0, %c0_i32 : i32, i32
  }
  func.func @transform_1(%arg0: i32) -> (i32, i32) {
    %c0_i32 = arith.constant 0 : i32
    %c0_i32_0 = arith.constant 0 : i32
    %c0_i32_1 = arith.constant 0 : i32
    return %c0_i32, %c0_i32_0 : i32, i32
  }
  func.func @transform_2(%arg0: i32) -> (i32, i32) {
    %c0_i32 = arith.constant 0 : i32
    %c0_i32_0 = arith.constant 0 : i32
    %c0_i32_1 = arith.constant 0 : i32
    return %c0_i32, %c0_i32_0 : i32, i32
  }
  func.func @transform_3(%arg0: i32) -> (i32, i32) {
    %c0_i32 = arith.constant 0 : i32
    %c0_i32_0 = arith.constant 0 : i32
    %c0_i32_1 = arith.constant 0 : i32
    return %c0_i32, %c0_i32_0 : i32, i32
  }
  func.func @transform_4(%arg0: i32) -> (i32, i32) {
    %c0_i32 = arith.constant 0 : i32
    %c0_i32_0 = arith.constant 0 : i32
    %c0_i32_1 = arith.constant 0 : i32
    return %c0_i32, %c0_i32_0 : i32, i32
  }
  func.func @transform_5(%arg0: i32) -> (i32, i32) {
    %c0_i32 = arith.constant 0 : i32
    %c0_i32_0 = arith.constant 0 : i32
    %c0_i32_1 = arith.constant 0 : i32
    return %c0_i32, %c0_i32_0 : i32, i32
  }
  func.func @transform_6(%arg0: i32) -> (i32, i32) {
    %c0_i32 = arith.constant 0 : i32
    %c0_i32_0 = arith.constant 0 : i32
    %c0_i32_1 = arith.constant 0 : i32
    return %c0_i32, %c0_i32_0 : i32, i32
  }
  func.func @transform_7(%arg0: i32) -> (i32, i32) {
    %c0_i32 = arith.constant 0 : i32
    %c0_i32_0 = arith.constant 0 : i32
    %c0_i32_1 = arith.constant 0 : i32
    return %c0_i32, %c0_i32_0 : i32, i32
  }
  func.func @transform_8(%arg0: i32) -> (i32, i32) {
    %c0_i32 = arith.constant 0 : i32
    %c0_i32_0 = arith.constant 0 : i32
    %c0_i32_1 = arith.constant 0 : i32
    return %c0_i32, %c0_i32_0 : i32, i32
  }
  func.func @transform_9(%arg0: i32) -> (i32, i32) {
    %c0_i32 = arith.constant 0 : i32
    %c0_i32_0 = arith.constant 0 : i32
    %c0_i32_1 = arith.constant 0 : i32
    return %c0_i32, %c0_i32_0 : i32, i32
  }
  func.func @transform_10(%arg0: i32) -> (i32, i32) {
    %c0_i32 = arith.constant 0 : i32
    %c0_i32_0 = arith.constant 0 : i32
    %c0_i32_1 = arith.constant 0 : i32
    return %c0_i32, %c0_i32_0 : i32, i32
  }
  func.func @transform_11(%arg0: i32) -> (i32, i32) {
    %c0_i32 = arith.constant 0 : i32
    %c0_i32_0 = arith.constant 0 : i32
    %c0_i32_1 = arith.constant 0 : i32
    return %c0_i32, %c0_i32_0 : i32, i32
  }
  func.func @transform_12(%arg0: i32) -> (i32, i32) {
    %c0_i32 = arith.constant 0 : i32
    %c0_i32_0 = arith.constant 0 : i32
    %c0_i32_1 = arith.constant 0 : i32
    return %c0_i32, %c0_i32_0 : i32, i32
  }
  func.func @transform_13(%arg0: i32) -> (i32, i32) {
    %c0_i32 = arith.constant 0 : i32
    %c0_i32_0 = arith.constant 0 : i32
    return %arg0, %c0_i32 : i32, i32
  }
}

</mosaic_0001>

<bundles_post_ra>
// kernel: mlp_forward.1
= control target key start
LH: loop header
LB: loop body
LE: loop exit
PB: predicated region body
PF: predicated region fallthrough
CT: control target
= control target key end

     0   :  { %s1020_s0 = inlined_call_operand.vmem [shape: f32[8,256], index: 0, kind: input, shape index: {}]   ;;  %s1021_s1 = inlined_call_operand.vmem [shape: f32[1,256], index: 1, kind: input, shape index: {}]   ;;  %s1022_s2 = inlined_call_operand.vmem [shape: f32[1,256], index: 2, kind: input, shape index: {}]   ;;  %s1023_s3 = inlined_call_operand.vmem [shape: bf16[256,32], index: 3, kind: input, shape index: {}]   ;;  %s1024_s4 = inlined_call_operand.vmem [shape: f32[1,32], index: 4, kind: input, shape index: {}]   ;;  %s1025_s5 = inlined_call_operand.vmem [shape: bf16[32,128], index: 5, kind: input, shape index: {}]   ;;  %s1026_s6 = inlined_call_operand.vmem [shape: f32[1,128], index: 6, kind: input, shape index: {}]   ;;  %s1027_s7 = inlined_call_operand.vmem [shape: bf16[128,32], index: 7, kind: input, shape index: {}]   ;;  %s1028_s8 = inlined_call_operand.vmem [shape: f32[1,32], index: 8, kind: input, shape index: {}]   ;;  %s1029_s9 = inlined_call_operand.vmem [shape: bf16[32,32], index: 9, kind: input, shape index: {}]   ;;  %s1030_s10 = inlined_call_operand.vmem [shape: f32[1,32], index: 10, kind: input, shape index: {}]   ;;  %s1031_s11 = inlined_call_operand.vmem [shape: bf16[32,16], index: 11, kind: input, shape index: {}]   ;;  %s1032_s12 = inlined_call_operand.vmem [shape: f32[1,16], index: 12, kind: input, shape index: {}]   ;;  %s1033_s13 = inlined_call_operand.hbm [shape: f32[8,16], index: 13, kind: output, shape index: {}]  }
   0x1   :  { %v46_v0 = vld [vmem:[%s1020_s0] sm:$0xff]  ;;  %v47_v1 = vld [vmem:[%s1020_s0 + $0x8] sm:$0xff] }
   0x2   :  { %v48_v2 = vadd.f32 %v47_v1, %v46_v0 }
   0x4   :  { %49 = vadd.xlane.f32.xlu0 %v48_v2 }
   0x5   :  { %18 = vsyncpa [#allocation3], 0  ;;  %v737_v3 = vld [vmem:[%s1023_s3 + $0x40] sm:$0xff]   ;;  %v739_v5 = vld [vmem:[%s1023_s3 + $0x48] sm:$0xff]   ;;  %v67_v28 = vlaneseq  ;;  %v793_v49 = vmov 0.0   ;;  %vm794_vm0 = vmmov 0  }
   0x6   :  { %v738_v4 = vld [vmem:[%s1023_s3] sm:$0xff]   ;;  %650 = vmatprep.subr.bf16.mxu0 %v737_v3  ;;  %v740_v6 = vld [vmem:[%s1023_s3 + $0x8] sm:$0xff]   ;;  %v741_v14 = vld [vmem:[%s1023_s3 + $0x50] sm:$0xff]   ;;  %690 = vmatprep.subr.bf16.mxu1 %v793_v49  ;;  %vm297_vm2 = vcmask 261120   ;;  %vm596_vm6 = vcmask 130048  }
   0x7   :  { %651 = vmatpush3.bf16.msra.mxu0 %v738_v4  ;;  %v742_v15 = vld [vmem:[%s1023_s3 + $0x10] sm:$0xff]   ;;  %v743_v16 = vld [vmem:[%s1023_s3 + $0x58] sm:$0xff]   ;;  %v745_v18 = vld [vmem:[%s1023_s3 + $0x60] sm:$0xff]   ;;  %v68_v30 = vshrl.u32 %v67_v28, 7  ;;  %694 = vmatprep.mubr.msk.bf16.mxu1 %vm794_vm0, %v793_v49 }
   0x8   :  { %652 = vmatprep.subr.bf16.mxu0 %v739_v5  ;;  %v744_v17 = vld [vmem:[%s1023_s3 + $0x18] sm:$0xff]   ;;  %v746_v19 = vld [vmem:[%s1023_s3 + $0x20] sm:$0xff]   ;;  %v747_v20 = vld [vmem:[%s1023_s3 + $0x68] sm:$0xff]  }
   0x9   :  { %v748_v21 = vld [vmem:[%s1023_s3 + $0x28] sm:$0xff]   ;;  %v749_v22 = vld [vmem:[%s1023_s3 + $0x70] sm:$0xff]   ;;  %v751_v24 = vld [vmem:[%s1023_s3 + $0x78] sm:$0xff]   ;;  %v69_v31 = vsub.s32 0, %v68_v30  ;;  %v73_v32 = vsub.s32 1, %v68_v30 }
   0xa   :  { %v750_v23 = vld [vmem:[%s1023_s3 + $0x30] sm:$0xff]   ;;  %v752_v25 = vld [vmem:[%s1023_s3 + $0x38] sm:$0xff]   ;;  %v65_v33 = vld [vmem:[%s1021_s1] sm:$0x3] }
   0xb   :  { %653 = vmatpush3.bf16.msra.mxu0 %v740_v6  ;;  %v79_v34 = vld [vmem:[%s1022_s2] sm:$0x3]  ;;  %v70_v35 = vrot.slane %v65_v33, %v69_v31  ;;  %v74_v36 = vrot.slane %v65_v33, %v73_v32  ;;  %v754_v50 = vld [vmem:[%s1025_s5 + $0x8] sm:$0xff]   ;;  %v757_v63 = vld [vmem:[%s1027_s7 + $0x10] sm:$0xff]  }
   0xc   :  { %654 = vmatprep.subr.bf16.mxu0 %v741_v14  ;;  %v84_v39 = vrot.slane %v79_v34, %v69_v31  ;;  %v88_v40 = vrot.slane %v79_v34, %v73_v32  ;;  %v753_v48 = vld [vmem:[%s1025_s5] sm:$0xff]   ;;  %v756_v62 = vld [vmem:[%s1027_s7 + $0x8] sm:$0xff]   ;;  %v761_v3 = vld [vmem:[%s1027_s7 + $0x30] sm:$0xff]  }
   0xd   :  { %691 = vmatpush3.bf16.msra.mxu1 %v753_v48  ;;  %v612_v52 = vld [vmem:[%s1024_s4] ss:$0 sm:$0xff]  ;;  %v760_v2 = vld [vmem:[%s1027_s7 + $0x28] sm:$0xff]   ;;  %v762_v4 = vld [vmem:[%s1027_s7 + $0x38] sm:$0xff]  }
   0xe   :  { %692 = vmatprep.subr.bf16.mxu1 %v793_v49  ;;  %v755_v60 = vld [vmem:[%s1027_s7] sm:$0xff]  }
   0xf   :  { %655 = vmatpush3.bf16.msra.mxu0 %v742_v15  ;;  %v629_v5 = vld [vmem:[%s1026_s6] ss:$0 sm:$0xff]  ;;  %v764_v15 = vld [vmem:[%s1029_s9 + $0x8] sm:$0xff]  }
  0x10   :  { %656 = vmatprep.subr.bf16.mxu0 %v743_v16  ;;  %v763_v14 = vld [vmem:[%s1029_s9] sm:$0xff]  }
  0x11   :  { %693 = vmatpush3.bf16.msra.mxu1 %v754_v50  ;;  %v633_v16 = vld [vmem:[%s1028_s8] ss:$0 sm:$0xff] }
  0x12   :  { %698 = vmatprep.subr.bf16.mxu1 %v793_v49 }
  0x13   :  { %657 = vmatpush3.bf16.msra.mxu0 %v744_v17 }
  0x14   :  { %658 = vmatprep.subr.bf16.mxu0 %v745_v18 }
  0x17   :  { %659 = vmatpush3.bf16.msra.mxu0 %v746_v19 }
  0x18   :  { %660 = vmatprep.subr.bf16.mxu0 %v747_v20 }
  0x1b   :  { %661 = vmatpush3.bf16.msra.mxu0 %v748_v21 }
  0x1c   :  { %662 = vmatprep.subr.bf16.mxu0 %v749_v22 }
  0x1f   :  { %663 = vmatpush3.bf16.msra.mxu0 %v750_v23 }
  0x20   :  { %664 = vmatprep.subr.bf16.mxu0 %v751_v24 }
  0x23   :  { %665 = vmatpush3.bf16.msra.mxu0 %v752_v25  ;;  %v765_v25 = vld [vmem:[%s1031_s11] sm:$0xff]  }
  0x24   :  { %718 = vmatprep.subr.bf16.mxu0 %v793_v49 }
  0x91   :  { %v50_v7 = vpop.xlane.xlu0 %49 }
  0x92   :  { %v52_v8 = vmul.f32 0.00390625, %v50_v7 }
  0x94   :  { %v53_v9 = vsub.f32 %v46_v0, %v52_v8  ;;  %v54_v10 = vsub.f32 %v47_v1, %v52_v8  ;;  %v758_v0 = vld [vmem:[%s1027_s7 + $0x18] sm:$0xff]   ;;  %v759_v1 = vld [vmem:[%s1027_s7 + $0x20] sm:$0xff]  }
  0x96   :  { %v55_v11 = vmul.f32 %v53_v9, %v53_v9  ;;  %v56_v12 = vmul.f32 %v54_v10, %v54_v10 }
  0x98   :  { %v57_v13 = vadd.f32 %v56_v12, %v55_v11 }
  0x9a   :  { %58 = vadd.xlane.f32.xlu0 %v57_v13 }
 0x127   :  { %v59_v26 = vpop.xlane.xlu0 %58 }
 0x128   :  { %v60_v27 = vmul.f32 0.00390625, %v59_v26  ;;  %v766_v26 = vld [vmem:[%s1031_s11 + $0x8] sm:$0xff]   ;;  %s795_s11 = smov [#allocation2]  }
 0x129   :  { %s604_s18 = sshll.u32 %s795_s11, 4  ;;  %s605_s18 = int_to_ptr.vmem [resolvable:$true] %s604_s18 }
 0x12a   :  { %v61_v29 = vadd.f32 1e-05, %v60_v27  ;;  %v642_v27 = vld [vmem:[%s1030_s10] ss:$0 sm:$0xff]  ;;  %s769_s10 = scalar_lea.vmem %s605_s18, 128  ;;  %p774_p1 = scmp.lt.s32.totalorder %s605_s18, %s605_s18 }
 0x12b   :  { %p770_p0 = scmp.ne.s32.totalorder %s605_s18, %s769_s10  ;;  %p775_p2 = scmp.lt.s32.totalorder %s769_s10, %s769_s10 }
 0x12c   :  { %767 = vrsqrt.f32 %v61_v29 }
 0x12d   :  { %p776_p3 = por %p775_p2, %p774_p1 }
 0x12f   :  { %p777_p4 = pnand %p776_p3, %p770_p0 }
 0x136   :  { %v768_v37 = vpop.eup %767 }
 0x137   :  { %v64_v38 = vmul.f32 %v768_v37, %v54_v10  ;;  %v63_v41 = vmul.f32 %v768_v37, %v53_v9 }
 0x139   :  { %v78_v42 = vmul.f32 %v74_v36, %v64_v38  ;;  %v77_v43 = vmul.f32 %v70_v35, %v63_v41  ;;  %v646_v36 = vld [vmem:[%s1032_s12] ss:$0 sm:$0xff] }
 0x13b   :  { %v92_v44 = vadd.f32 %v88_v40, %v78_v42  ;;  %v91_v45 = vadd.f32 %v84_v39, %v77_v43 }
 0x13d   :  { %v94_v46 = vpack.c.bf16 %v92_v44, %v92_v44  ;;  %v93_v47 = vpack.c.bf16 %v91_v45, %v91_v45 }
 0x13f   :  { %262 = vmatprep.mubr.bf16.mxu0 %v94_v46 }
 0x140   :  { %263 = vmatmul.mubr.bf16.vlgmr.msra.gmra.mrb[0].mxu0 %v93_v47 }
 0x141   :  { %722 = vmatprep.mubr.msk.bf16.mxu0 %vm794_vm0, %v793_v49  ;;  %719 = vmatpush3.bf16.msra.mxu0 %v763_v14 }
 0x142   :  { %720 = vmatprep.subr.bf16.mxu0 %v793_v49 }
 0x145   :  { %721 = vmatpush3.bf16.msra.mxu0 %v764_v15 }
 0x146   :  { %726 = vmatprep.subr.bf16.mxu0 %v793_v49 }
 0x213   :  { %v666_v51 = vpop.f32.mrb[0].mxu0 }
 0x214   :  { %v667_v53 = vpop.f32.mrb[1].mxu0 }
 0x215   :  { %v668_v54 = vadd.f32 %v667_v53, %v666_v51  ;;  %v669_v55 = vpop.f32.mrb[2].mxu0 }
 0x216   :  { %v670_v56 = vpop.f32.mrb[3].mxu0 }
 0x217   :  { %v265_v57 = vadd.f32 %v668_v54, %v612_v52 }
 0x219   :  { %vm270_vm1 = vcmp.ge.f32.partialorder %v265_v57, 0.0  ;;  %v271_v58 = vmul.f32 0.01, %v265_v57 }
 0x21b   :  { %v272_v59 = vsel %vm270_vm1, %v265_v57, %v271_v58 }
 0x21c   :  { %v273_v61 = vpack.c.bf16 %v272_v59, %v272_v59 }
 0x21e   :  { %695 = vmatmul.mubr.msk.bf16.vlgmr.msra.gmra.mrb[0].mxu1 %vm297_vm2, %v273_v61 }
 0x21f   :  { %699 = vmatpush3.bf16.msra.mxu1 %v755_v60  ;;  %714 = vmatprep.mubr.msk.bf16.mxu1 %vm794_vm0, %v793_v49 }
 0x220   :  { %700 = vmatprep.subr.bf16.mxu1 %v793_v49 }
 0x223   :  { %701 = vmatpush3.bf16.msra.mxu1 %v756_v62 }
 0x224   :  { %702 = vmatprep.subr.bf16.mxu1 %v793_v49 }
 0x227   :  { %703 = vmatpush3.bf16.msra.mxu1 %v757_v63 }
 0x228   :  { %704 = vmatprep.subr.bf16.mxu1 %v793_v49 }
 0x22b   :  { %705 = vmatpush3.bf16.msra.mxu1 %v758_v0 }
 0x22c   :  { %706 = vmatprep.subr.bf16.mxu1 %v793_v49 }
 0x22f   :  { %707 = vmatpush3.bf16.msra.mxu1 %v759_v1 }
 0x230   :  { %708 = vmatprep.subr.bf16.mxu1 %v793_v49 }
 0x233   :  { %709 = vmatpush3.bf16.msra.mxu1 %v760_v2 }
 0x234   :  { %710 = vmatprep.subr.bf16.mxu1 %v793_v49 }
 0x237   :  { %711 = vmatpush3.bf16.msra.mxu1 %v761_v3 }
 0x238   :  { %712 = vmatprep.subr.bf16.mxu1 %v793_v49 }
 0x23b   :  { %713 = vmatpush3.bf16.msra.mxu1 %v762_v4 }
 0x2f1   :  { %v335_v6 = vpop.f32.mrb[0].mxu1 }
 0x2f2   :  { %v336_v7 = vadd.f32 %v629_v5, %v335_v6  ;;  %v696_v8 = vpop.f32.mrb[1].mxu1 }
 0x2f3   :  { %v338_v9 = vpop.f32.mrb[2].mxu1 }
 0x2f4   :  { %vm341_vm3 = vcmp.ge.f32.partialorder %v336_v7, 0.0  ;;  %v342_v10 = vmul.f32 0.01, %v336_v7  ;;  %v697_v11 = vpop.f32.mrb[3].mxu1 }
 0x2f6   :  { %v343_v12 = vsel %vm341_vm3, %v336_v7, %v342_v10 }
 0x2f7   :  { %v344_v13 = vpack.c.bf16 %v343_v12, %v343_v12 }
 0x2f9   :  { %715 = vmatmul.mubr.bf16.vlgmr.msra.gmra.mrb[4].mxu1 %v344_v13 }
 0x3cc   :  { %v450_v17 = vpop.f32.mrb[4].mxu1 }
 0x3cd   :  { %v451_v18 = vadd.f32 %v633_v16, %v450_v17  ;;  %v716_v19 = vpop.f32.mrb[5].mxu1 }
 0x3ce   :  { %v453_v20 = vpop.f32.mrb[6].mxu1 }
 0x3cf   :  { %vm456_vm4 = vcmp.ge.f32.partialorder %v451_v18, 0.0  ;;  %v457_v21 = vmul.f32 0.01, %v451_v18  ;;  %v717_v22 = vpop.f32.mrb[7].mxu1 }
 0x3d1   :  { %v458_v23 = vsel %vm456_vm4, %v451_v18, %v457_v21 }
 0x3d2   :  { %v459_v24 = vpack.c.bf16 %v458_v23, %v458_v23 }
 0x3d4   :  { %723 = vmatmul.mubr.msk.bf16.vlgmr.msra.gmra.mrb[4].mxu0 %vm297_vm2, %v459_v24 }
 0x3d5   :  { %730 = vmatprep.mubr.msk.bf16.mxu0 %vm794_vm0, %v793_v49  ;;  %727 = vmatpush3.bf16.msra.mxu0 %v765_v25 }
 0x3d6   :  { %728 = vmatprep.subr.bf16.mxu0 %v793_v49 }
 0x3d9   :  { %729 = vmatpush3.bf16.msra.mxu0 %v766_v26 }
 0x4a7   :  { %v520_v28 = vpop.f32.mrb[4].mxu0 }
 0x4a8   :  { %v521_v29 = vadd.f32 %v642_v27, %v520_v28  ;;  %v724_v30 = vpop.f32.mrb[5].mxu0 }
 0x4a9   :  { %v523_v31 = vpop.f32.mrb[6].mxu0 }
 0x4aa   :  { %vm526_vm5 = vcmp.ge.f32.partialorder %v521_v29, 0.0  ;;  %v527_v32 = vmul.f32 0.01, %v521_v29  ;;  %v725_v33 = vpop.f32.mrb[7].mxu0 }
 0x4ac   :  { %v528_v34 = vsel %vm526_vm5, %v521_v29, %v527_v32 }
 0x4ad   :  { %v529_v35 = vpack.c.bf16 %v528_v34, %v528_v34 }
 0x4af   :  { %731 = vmatmul.mubr.msk.bf16.vlgmr.msra.gmra.mrb[8].mxu0 %vm297_vm2, %v529_v35 }
 0x582   :  { %v590_v37 = vpop.f32.mrb[8].mxu0 }
 0x583   :  { %v591_v38 = vadd.f32 %v646_v36, %v590_v37  ;;  %v732_v39 = vpop.f32.mrb[9].mxu0 }
 0x584   :  { %v593_v40 = vpop.f32.mrb[10].mxu0 }
 0x585   :  { %v733_v41 = vpop.f32.mrb[11].mxu0  ;;  %597 = vst.msk [vmem:[#allocation2] sm:$0xff] %vm596_vm6, %v591_v38 }
 0x586   :  { %780 = shalt.err (!%p777_p4)
}
 0x587   :  { %s781_s12 = scalar_lea.hbm %s1033_s13, 128 }
 0x588   :  { %p782_p5 = scmp.ne.s32.totalorder %s1033_s13, %s781_s12  ;;  %p785_p6 = scmp.lt.u32.totalorder %s781_s12, %s1033_s13 }
 0x58a   :  { %p787_p7 = pnand %p785_p6, %p782_p5 }
 0x58c   :  { %790 = shalt.err (!%p787_p7)
}
 0x58d   :  { %607 = dma.vmem_to_hbm [thread:$0]  %s605_s18, 128, %s1033_s13, [#allocation3]  }
 0x58e   :  { %791 = dma.done.wait [#allocation3], 128  }
 0x58f   :  { %792 = vsyncadd [#allocation3], 4294967168 }
 0x590   :  { %611 = vsyncpa [#allocation3], 1 }

</bundles_post_ra>
